<compile_context>
chip_gen: v6e
topology: v6e:2x2x1
jax: 0.10.0
libtpu: 0.0.40
codegen_flags: <defaults>
</compile_context>

<pallas_src>
import functools

import jax
import jax.numpy as jnp
from jax.experimental import pallas as pl
from jax.experimental.pallas import tpu as pltpu


# Below this many total input bytes, XLA's own concatenate is already at
# roofline and the Pallas custom-call / pipeline-warmup overhead is a net loss.
_PALLAS_MIN_BYTES = 512 * 1024


def _chip_defaults():
    """Per-generation tuning: (combined block-target bytes, low_store_bw flag).

    v6e/v7x: 8 MiB combined per grid step (16 MiB double-buffered, fits the
    32 MiB default scoped VMEM) and 2 store slots -> masked stores tolerable.
    v5e / unknown: 4 MiB (16 MiB default scoped VMEM) and only 1 vst slot ->
    avoid the unaligned-split masked-store path entirely.
    """
    try:
        kind = jax.devices()[0].device_kind.lower()
    except Exception:  # pragma: no cover - defensive; never expected on TPU
        kind = ""
    old_gen = (not kind) or any(g in kind for g in ("v2", "v3", "v4", "v5"))
    if old_gen:
        return 4 * 1024 * 1024, True
    return 8 * 1024 * 1024, False


def _concat_kernel(h_ref, hp_ref, o_ref, *, m: int):
    # Pure data movement on the load/store path: h block goes to the low
    # feature lanes of the output block, h_prev block right after it.
    # dtype promotion happens here (free VPU cast under the HBM roofline)
    # instead of as an extra HBM pass in the wrapper.  Slices are static;
    # when m is a multiple of 128 both stores are lane-aligned (unmasked).
    o_ref[:, :m] = h_ref[...].astype(o_ref.dtype)
    o_ref[:, m:] = hp_ref[...].astype(o_ref.dtype)


def _pallas_concat_last_dim(h, h_prev, *,
                            block_target_bytes=None,
                            min_pallas_bytes=None):
    """Concatenate (..., m) and (..., n) arrays along the last axis."""
    assert h.shape[:-1] == h_prev.shape[:-1], (h.shape, h_prev.shape)
    out_dtype = jnp.promote_types(h.dtype, h_prev.dtype)

    default_target, low_store_bw = _chip_defaults()
    if block_target_bytes is None:
        block_target_bytes = default_target
    if min_pallas_bytes is None:
        min_pallas_bytes = _PALLAS_MIN_BYTES

    lead = h.shape[:-1]
    m = h.shape[-1]
    n = h_prev.shape[-1]
    out_w = m + n

    rows = 1
    for d in lead:
        rows *= d

    # Tiny tensors: skip the custom call entirely (fixed overhead dominates).
    if h.nbytes + h_prev.nbytes < min_pallas_bytes:
        return jnp.concatenate([h, h_prev], axis=-1).astype(out_dtype)

    # Unaligned feature split on v5e-class parts: the second store needs an
    # XLU cross-lane shift plus masked vst.msk partial stores, which can make
    # the single store slot (not HBM) the binding unit.  XLA concat wins there.
    if low_store_bw and (m % 128 != 0):
        return jnp.concatenate([h, h_prev], axis=-1).astype(out_dtype)

    h2 = h.reshape(rows, m)
    hp2 = h_prev.reshape(rows, n)

    h_is = jnp.dtype(h.dtype).itemsize
    hp_is = jnp.dtype(h_prev.dtype).itemsize
    out_is = jnp.dtype(out_dtype).itemsize

    # Sublane packing of the narrowest dtype in play: 8 rows for 32-bit,
    # 16 for bf16, 32 for int8/fp8.
    min_is = min(h_is, hp_is, out_is)
    row_mult = 8 * max(1, 4 // min_is)

    # Byte-targeted row tile: combined (h + h_prev + out) block bytes per row.
    bytes_per_row = m * h_is + n * hp_is + out_w * out_is
    row_tile = (block_target_bytes // bytes_per_row) // row_mult * row_mult
    row_tile = max(row_mult, row_tile)
    if row_tile >= rows:
        row_tile = rows  # single block; full-extent blocks are always legal
    grid = (pl.cdiv(rows, row_tile),)

    # Total HBM traffic: read both inputs + write the output (no flops).
    bytes_accessed = h2.nbytes + hp2.nbytes + rows * out_w * out_is

    kernel = functools.partial(_concat_kernel, m=m)
    out = pl.pallas_call(
        kernel,
        out_shape=jax.ShapeDtypeStruct((rows, out_w), out_dtype),
        grid=grid,
        in_specs=[
            pl.BlockSpec((row_tile, m), lambda i: (i, 0)),
            pl.BlockSpec((row_tile, n), lambda i: (i, 0)),
        ],
        out_specs=pl.BlockSpec((row_tile, out_w), lambda i: (i, 0)),
        compiler_params=pltpu.CompilerParams(
            dimension_semantics=("parallel",),  # lets v7x shard rows over 2 TCs
        ),
        cost_estimate=pl.CostEstimate(
            flops=0, transcendentals=0, bytes_accessed=bytes_accessed),
    )(h2, hp2)
    return out.reshape(*lead, out_w) if lead else out.reshape(out_w)


class ResidualConnectionConcat:
    """JAX/Pallas port of graphium's ResidualConnectionConcat.

    No weights (has_weights == False); the output feature dim grows by the
    previous layer's dim on skip steps (h_dim_increase_type == "previous").
    """

    h_dim_increase_type = "previous"
    has_weights = False

    def __init__(self, skip_steps: int = 1):
        self.skip_steps = skip_steps

    def __repr__(self):
        return f"{self.__class__.__name__}(skip_steps={self.skip_steps})"

    def _bool_apply_skip_step(self, step_idx: int) -> bool:
        return self.skip_steps != 0 and step_idx % self.skip_steps == 0

    def get_true_out_dims(self, out_dims):
        # Pure-Python bookkeeping, identical to the reference "previous" branch.
        true_out_dims = [out_dims[0]]
        out_dims_at_skip = [out_dims[0]]
        for ii in range(1, len(out_dims) - 1):
            if self._bool_apply_skip_step(step_idx=ii):
                true_out_dims.append(out_dims[ii] + out_dims_at_skip[-1])
                out_dims_at_skip.append(out_dims[ii])
            else:
                true_out_dims.append(out_dims[ii])
        return true_out_dims

    def forward(self, h, h_prev, step_idx: int):
        if self._bool_apply_skip_step(step_idx):
            h_in = h
            if step_idx > 0:
                h = _pallas_concat_last_dim(h, h_prev)
            h_prev = h_in  # NOTE: pre-concat h, exactly as in the reference
        return h, h_prev

    def __call__(self, h, h_prev, step_idx: int):
        return self.forward(h, h_prev, step_idx)


if __name__ == "__main__":
    key = jax.random.PRNGKey(0)
    k1, k2, k3, k4, k5, k6 = jax.random.split(key, 6)

    # Small shapes consistent with the module's (..., m) convention.
    # hidden=128 keeps the concat split point lane-aligned for the demo.
    batch, nodes, hidden = 2, 64, 128
    h0 = jax.random.normal(k1, (batch, nodes, hidden), dtype=jnp.float32)
    h1 = jax.random.normal(k2, (batch, nodes, hidden), dtype=jnp.float32)

    res = ResidualConnectionConcat(skip_steps=1)

    # step 0: h_prev is None -> h returned unchanged, h_prev set to h.
    h_out0, h_prev0 = res(h0, None, step_idx=0)
    assert h_out0 is h0 and h_prev0 is h0

    # step 1: skip applies and step_idx > 0 -> concat on the feature axis
    # (this small shape routes through the XLA fast path by design).
    h_out1, h_prev1 = res(h1, h_prev0, step_idx=1)
    jax.block_until_ready(h_out1)
    expected = jnp.concatenate([h1, h_prev0], axis=-1)
    assert h_out1.shape == (batch, nodes, 2 * hidden)
    assert jnp.array_equal(h_out1, expected), "concat mismatch"
    # Per the reference module, h_prev becomes the *pre-concat* h (h_in).
    assert h_prev1 is h1

    # skip_steps=2: at step_idx=1 nothing should change.
    res2 = ResidualConnectionConcat(skip_steps=2)
    h_s, hp_s = res2(h1, h0, step_idx=1)
    assert h_s is h1 and hp_s is h0

    # Exercise the tiled Pallas path explicitly: cdiv grid with a ragged last
    # block (204 rows, 8-row tiles) forced via a tiny block-byte target.
    ha = jax.random.normal(k3, (204, hidden), dtype=jnp.float32)
    hb = jax.random.normal(k4, (204, hidden), dtype=jnp.float32)
    out_t = _pallas_concat_last_dim(
        ha, hb, block_target_bytes=16 * 1024, min_pallas_bytes=0)
    jax.block_until_ready(out_t)
    assert jnp.array_equal(out_t, jnp.concatenate([ha, hb], axis=-1))

    # Mixed-precision path: cast happens inside the kernel (bf16 + f32 -> f32);
    # 1024 rows puts this above _PALLAS_MIN_BYTES so it takes the Pallas path.
    hc = jax.random.normal(k5, (1024, hidden), dtype=jnp.bfloat16)
    hd = jax.random.normal(k6, (1024, hidden), dtype=jnp.float32)
    out_m = _pallas_concat_last_dim(hc, hd)
    jax.block_until_ready(out_m)
    assert out_m.dtype == jnp.float32
    assert jnp.array_equal(out_m, jnp.concatenate([hc, hd], axis=-1))

    print("KERNEL_OK")
</pallas_src>

<mosaic_0001>
module attributes {stable_mosaic.version = 11 : i64} {
  func.func @_concat_kernel(%arg0: i32, %arg1: memref<8x128xf32, #tpu.memory_space<vmem>>, %arg2: memref<8x128xf32, #tpu.memory_space<vmem>>, %arg3: memref<8x256xf32, #tpu.memory_space<vmem>>) attributes {dimension_semantics = [#tpu.dimension_semantics<parallel>], iteration_bounds = array<i64: 26>, scalar_prefetch = 0 : i64, scratch_operands = 0 : i64, tpu.core_type = #tpu.core_type<tc>, window_params = [{transform_indices = @transform_0, window_bounds = array<i64: 8, 128>}, {transform_indices = @transform_1, window_bounds = array<i64: 8, 128>}, {transform_indices = @transform_2, window_bounds = array<i64: 8, 256>}]} {
    %c0 = arith.constant 0 : index
    %c0_0 = arith.constant 0 : index
    %0 = vector.load %arg1[%c0, %c0_0] : memref<8x128xf32, #tpu.memory_space<vmem>>, vector<8x128xf32>
    %c0_1 = arith.constant 0 : index
    %c0_2 = arith.constant 0 : index
    %1 = vector.load %arg3[%c0_1, %c0_2] : memref<8x256xf32, #tpu.memory_space<vmem>>, vector<8x128xf32>
    tpu.vector_store %arg3[%c0_1, %c0_2], %0 {strides = array<i32>} : memref<8x256xf32, #tpu.memory_space<vmem>>, vector<8x128xf32>,
    %c0_3 = arith.constant 0 : index
    %c0_4 = arith.constant 0 : index
    %2 = vector.load %arg2[%c0_3, %c0_4] : memref<8x128xf32, #tpu.memory_space<vmem>>, vector<8x128xf32>
    %c0_5 = arith.constant 0 : index
    %c128 = arith.constant 128 : index
    %3 = vector.load %arg3[%c0_5, %c128] : memref<8x256xf32, #tpu.memory_space<vmem>>, vector<8x128xf32>
    tpu.vector_store %arg3[%c0_5, %c128], %2 {strides = array<i32>} : memref<8x256xf32, #tpu.memory_space<vmem>>, vector<8x128xf32>,
    return
  }
  func.func @transform_0(%arg0: i32) -> (i32, i32) {
    %c0_i32 = arith.constant 0 : i32
    %c0_i32_0 = arith.constant 0 : i32
    return %arg0, %c0_i32 : i32, i32
  }
  func.func @transform_1(%arg0: i32) -> (i32, i32) {
    %c0_i32 = arith.constant 0 : i32
    %c0_i32_0 = arith.constant 0 : i32
    return %arg0, %c0_i32 : i32, i32
  }
  func.func @transform_2(%arg0: i32) -> (i32, i32) {
    %c0_i32 = arith.constant 0 : i32
    %c0_i32_0 = arith.constant 0 : i32
    return %arg0, %c0_i32 : i32, i32
  }
}

</mosaic_0001>

<bundles_post_ra>
// kernel: tpu_custom_call.1
= control target key start
LH: loop header
LB: loop body
LE: loop exit
PB: predicated region body
PF: predicated region fallthrough
CT: control target
= control target key end

     0   :  { %7 = vsyncpa [#allocation3], 0  ;;  %s725_s0 = inlined_call_operand.hbm [shape: f32[204,128], index: 0, kind: input, shape index: {}]   ;;  %s726_s1 = inlined_call_operand.hbm [shape: f32[204,128], index: 1, kind: input, shape index: {}]   ;;  %s727_s2 = inlined_call_operand.hbm [shape: f32[204,256], index: 2, kind: output, shape index: {}]  }
   0x1   :  { %9 = vsyncpa [#allocation3 + $0x1], 0 }
   0x2   :  { %10 = vsyncpa [#allocation6], 0 }
   0x3   :  { %12 = vsyncpa [#allocation6 + $0x1], 0 }
   0x4   :  { %13 = vsyncpa [#allocation4], 0 }
   0x5   :  { %15 = vsyncpa [#allocation4 + $0x1], 0  ;;  %s520_s9 = smov 0   ;;  %s522_s10 = smov 0  }
   0x6   :  { %s524_s11 = smov 0   ;;  %s526_s12 = smov 0  }
   0x7 LB: > { %s541_s13 = sadd.s32 4294967295, %s500_s12   ;;  %s308_s14 = sadd.s32 4294967294, %s500_s12   ;;  %s500_s12 = sphi %s526_s12, %s745_s12   ;;  %s496_s11 = sphi %s524_s11, %s744_s11   ;;  %s492_s10 = sphi %s522_s10, %s743_s10   ;;  %s488_s9 = sphi %s520_s9, %s742_s9  }
   0x8   : > { %s545_s15 = sadd.s32 1, %s500_s12   ;;  %s28_s16 = sadd.s32 1, %s496_s11 }
   0x9   : > { %s25_s17 = ssub.s32 %s500_s12, %s545_s15  ;;  %p35_p0 = scmp.ne.s32.totalorder %s496_s11, %s492_s10 }
   0xa   : > { %p26_p1 = scmp.eq.s32.totalorder %s25_s17, 0  ;;  %p36_p2 = scmp.eq.s32.totalorder %s500_s12, 0 }
   0xb   : > { %p41_p3 = scmp.ne.s32.totalorder %s492_s10, %s488_s9  ;;  %p42_p4 = scmp.eq.s32.totalorder %s541_s13, 0 }
   0xc   : > { %s557_s18 = scalar_select %p26_p1, %s496_s11, %s28_s16  }
   0xd   : > { %p559_p5 = por %p36_p2, %p35_p0  ;;  %p563_p6 = por %p42_p4, %p41_p3 }
   0xe   : > { %p91_p7 = scmp.eq.s32.totalorder %s541_s13, 25  ;;  %p97_p8 = scmp.eq.s32.totalorder %s308_s14, 25 }
   0xf   : > { %s731_s20 = scalar_select %p563_p6, 1, 0 }
  0x10   : > { %p342_p9 = scmp.lt.s32.totalorder %s500_s12, 26  ;;  %p569_p10 = por %p91_p7, %p35_p0 }
  0x11   : > { %p573_p11 = por %p97_p8, %p41_p3  ;;  %s578_s23 = sand.u32 1, %s496_s11  }
  0x12   : > { %s732_s21 = scalar_select %p569_p10, 1, 0 }
  0x13   : > { %s733_s22 = scalar_select %p573_p11, 1, 0 }
  0x14   : > { %s312_s24 = sshll.u32 %s500_s12, 7  ;;  %s311_s25 = sshll.u32 %s578_s23, 3 }
  0x15   : > { %s587_s28 = scalar_lea.hbm %s725_s0, %s312_s24  ;;  %s121_s29 = scalar_lea.vmem [#allocation2], %s311_s25 }
  0x16   : > { %s128_s30 = sshll.u32 %s121_s29, 4  ;;  %p593_p12 = pnand %p342_p9, %p559_p5  ;;  %s597_s30 = int_to_ptr.vmem [resolvable:$true] %s128_s30 }
  0x17   : > { %s118_s4 = scalar_lea.sflag [#allocation3], %s578_s23  ;;  %s376_s5 = scalar_lea.hbm %s587_s28, 128 }
  0x18   : > { %p377_p1 = scmp.ne.s32.totalorder %s587_s28, %s376_s5  ;;  %p378_p2 = pneg %p593_p12 }
  0x19   : > { %s381_s8 = scalar_lea.hbm %s725_s0, 3328  ;;  %p382_p5 = scmp.lt.s32.totalorder %s587_s28, %s725_s0 }
  0x1a   : > { %p379_p3 = pnand %p378_p2, %p377_p1  ;;  %p383_p7 = scmp.lt.s32.totalorder %s381_s8, %s376_s5 }
  0x1c   : > { %p380_p4 = pneg %p379_p3  ;;  %p384_p8 = por %p383_p7, %p382_p5 }
  0x1e   : > { %p385_p9 = pnand %p384_p8, %p380_p4 }
  0x20   : > { %388 = shalt.err (!%p385_p9)
}
  0x21   : > { %s389_s17 = scalar_lea.vmem %s597_s30, 128  ;;  %s502_s19 = smov [#allocation2]  }
  0x22   : > { %p390_p13 = scmp.ne.s32.totalorder %s597_s30, %s389_s17  ;;  %s394_s26 = sshll.u32 %s502_s19, 4  ;;  %s395_s26 = int_to_ptr.vmem [resolvable:$false] %s394_s26 }
  0x23   : > { %s396_s27 = scalar_lea.vmem %s395_s26, 256  ;;  %p397_p0 = scmp.lt.s32.totalorder %s597_s30, %s395_s26 }
  0x24   : > { %p392_p1 = pnand %p390_p13, %p378_p2  ;;  %p398_p11 = scmp.lt.s32.totalorder %s396_s27, %s389_s17 }
  0x26   : > { %p393_p3 = pneg %p392_p1  ;;  %p399_p10 = por %p398_p11, %p397_p0 }
  0x28   : > { %p400_p5 = pnand %p399_p10, %p393_p3 }
  0x2a   : > { %403 = shalt.err (!%p400_p5)
}
  0x2b   : > { %334 = dma.hbm_to_vmem [thread:$0]  (!%p593_p12), %s587_s28, 128, %s597_s30, %s118_s4  }
  0x2c   : > { %p735_p13 = scmp.lt.s32.totalorder %s500_s12, 27  ;;  %p736_p4 = scmp.ge.s32.totalorder %s500_s12, 1 }
  0x2d   : > { %s639_s7 = scalar_lea.hbm %s726_s1, %s312_s24  ;;  %s139_s8 = scalar_lea.vmem [#allocation5], %s311_s25 }
  0x2e   : > { %p630_p7 = pnand %p736_p4, %p735_p13  ;;  %s146_s14 = sshll.u32 %s139_s8, 4  ;;  %s147_s14 = int_to_ptr.vmem [resolvable:$true] %s146_s14 }
  0x2f   : > { %s136_s28 = scalar_lea.sflag [#allocation6], %s578_s23  ;;  %s404_s30 = scalar_lea.hbm %s639_s7, 128 }
  0x30   : > { %s737_s29 = scalar_select %p630_p7, 1, 0 }
  0x31   : > { %p405_p10 = scmp.ne.s32.totalorder %s639_s7, %s404_s30  ;;  %s409_s17 = scalar_lea.hbm %s726_s1, 3328 }
  0x32   : > { %p410_p8 = scmp.lt.s32.totalorder %s639_s7, %s726_s1  ;;  %p411_p9 = scmp.lt.s32.totalorder %s409_s17, %s404_s30 }
  0x33   : > { %p407_p11 = pnand %p405_p10, %p378_p2 }
  0x34   : > { %p412_p1 = por %p411_p9, %p410_p8 }
  0x35   : > { %p408_p0 = pneg %p407_p11 }
  0x37   : > { %p413_p3 = pnand %p412_p1, %p408_p0 }
  0x39   : > { %416 = shalt.err (!%p413_p3)
}
  0x3a   : > { %s417_s25 = scalar_lea.vmem %s147_s14, 128  ;;  %s503_s23 = smov [#allocation5]  }
  0x3b   : > { %p418_p5 = scmp.ne.s32.totalorder %s147_s14, %s417_s25  ;;  %s422_s26 = sshll.u32 %s503_s23, 4  ;;  %s423_s26 = int_to_ptr.vmem [resolvable:$false] %s422_s26 }
  0x3c   : > { %s424_s27 = scalar_lea.vmem %s423_s26, 256  ;;  %p425_p10 = scmp.lt.s32.totalorder %s147_s14, %s423_s26 }
  0x3d   : > { %p420_p13 = pnand %p418_p5, %p378_p2  ;;  %p426_p11 = scmp.lt.s32.totalorder %s424_s27, %s417_s25 }
  0x3f   : > { %p421_p4 = pneg %p420_p13  ;;  %p427_p6 = por %p426_p11, %p425_p10 }
  0x41   : > { %p428_p7 = pnand %p427_p6, %p421_p4 }
  0x43   : > { %431 = shalt.err (!%p428_p7)
}
  0x44   : > { %337 = dma.hbm_to_vmem [thread:$0]  (!%p593_p12), %s639_s7, 128, %s147_s14, %s136_s28  }
  0x45   : > { %p738_p0 = scmp.ne.s32.totalorder %s737_s29, 0 }
  0x46   : > { %s665_s5 = sand.u32 (!%p738_p0), 1, %s492_s10   ;;  %p739_p2 = scmp.ne.s32.totalorder (!%p738_p0), %s731_s20, 0 }
  0x47   : > { %155 = sbr.rel (%p738_p0) target bundleno = 104 (0x68), region = 28  ;;  %s316_s6 = sshll.u32 (!%p738_p0), %s665_s5, 3 }
  0x48   : > { %s158_s8 = scalar_lea.sflag (!%p738_p0), [#allocation3], %s665_s5  ;;  %s161_s30 = scalar_lea.vmem (!%p738_p0), [#allocation2], %s316_s6 }
  0x4c   : > { %475 = dma.done.wait (%p739_p2), %s158_s8, 128  }
  0x4d   : > { %477 = vsyncadd (%p739_p2), %s158_s8, 4294967168  ;;  %s167_s3 = scalar_lea.sflag [#allocation6], %s665_s5  ;;  %s170_s7 = scalar_lea.vmem [#allocation5], %s316_s6 }
  0x4e   : > { %479 = dma.done.wait (%p739_p2), %s167_s3, 128  }
  0x4f   : > { %481 = vsyncadd (%p739_p2), %s167_s3, 4294967168  ;;  %s318_s29 = sshll.u32 %s665_s5, 4  ;;  %s324_s4 = sshll.u32 %s541_s13, 8  ;;  %v196_v0 = vld [vmem:[%s161_s30] sm:$0xff]  ;;  %v198_v1 = vld [vmem:[%s170_s7] sm:$0xff] }
  0x50   : > { %s195_s14 = scalar_lea.vmem [#allocation7], %s318_s29  ;;  %s685_s24 = scalar_lea.hbm %s727_s2, %s324_s4 }
  0x51   : > { %s215_s28 = sshll.u32 %s195_s14, 4  ;;  %197 = vst [vmem:[%s195_s14] sm:$0xff] %v196_v0  ;;  %199 = vst [vmem:[%s195_s14 + $0x8] sm:$0xff] %v198_v1  ;;  %s201_s20 = scalar_lea.sflag [#allocation4], %s665_s5  ;;  %s680_s28 = int_to_ptr.vmem [resolvable:$true] %s215_s28 }
  0x52   : > { %s432_s19 = scalar_lea.vmem %s680_s28, 256  ;;  %p740_p12 = scmp.ne.s32.totalorder %s732_s21, 0 }
  0x53   : > { %p433_p6 = scmp.ne.s32.totalorder %s680_s28, %s432_s19  ;;  %s504_s13 = smov [#allocation7]  }
  0x54   : > { %s436_s25 = sshll.u32 %s504_s13, 4  ;;  %s437_s25 = int_to_ptr.vmem [resolvable:$false] %s436_s25 }
  0x55   : > { %p434_p7 = pnand %p433_p6, %p740_p12  ;;  %s438_s23 = scalar_lea.vmem %s437_s25, 512 }
  0x56   : > { %p439_p9 = scmp.lt.s32.totalorder %s680_s28, %s437_s25  ;;  %p440_p1 = scmp.lt.s32.totalorder %s438_s23, %s432_s19 }
  0x57   : > { %p435_p8 = pneg %p434_p7 }
  0x58   : > { %p441_p3 = por %p440_p1, %p439_p9 }
  0x5a   : > { %p442_p5 = pnand %p441_p3, %p435_p8 }
  0x5c   : > { %445 = shalt.err (!%p442_p5)
}
  0x5d   : > { %s446_s26 = scalar_lea.hbm %s685_s24, 256  ;;  %s450_s6 = scalar_lea.hbm %s727_s2, 6656 }
  0x5e   : > { %p447_p13 = scmp.ne.s32.totalorder %s685_s24, %s446_s26  ;;  %p451_p11 = scmp.lt.s32.totalorder %s685_s24, %s727_s2 }
  0x5f   : > { %p452_p0 = scmp.lt.s32.totalorder %s450_s6, %s446_s26 }
  0x60   : > { %p448_p4 = pnand %p447_p13, %p740_p12 }
  0x61   : > { %p453_p2 = por %p452_p0, %p451_p11 }
  0x62   : > { %p449_p10 = pneg %p448_p4 }
  0x64   : > { %p454_p6 = pnand %p453_p2, %p449_p10 }
  0x66   : > { %457 = shalt.err (!%p454_p6)
}
  0x67   : > { %329 = dma.vmem_to_hbm [thread:$0]  (%p740_p12), %s680_s28, 256, %s685_s24, %s201_s20  }
  0x68 PF: > { %p343_p7 = scmp.ge.s32.totalorder %s500_s12, 2  ;;  %s227_s3 = sand.u32 1, %s488_s9  }
  0x69   : > { %p741_p8 = scmp.ne.s32.totalorder %s733_s22, 0  ;;  %s228_s7 = scalar_lea.sflag [#allocation4], %s227_s3 }
  0x6b   : > { %p339_p9 = pnand %p343_p7, %p741_p8 }
  0x6d   : > { %p340_p1 = pneg %p339_p9 }
  0x6f   : > { %483 = dma.done.wait (%p340_p1), %s228_s7, 256  }
  0x70   : > { %485 = vsyncadd (%p340_p1), %s228_s7, 4294967040  ;;  %p18_p3 = scmp.ge.s32.totalorder %s545_s15, 28   ;;  %s742_s9 = smov %s492_s10 }
  0x71   : > { %s743_s10 = smov %s496_s11  ;;  %s744_s11 = smov %s557_s18 }
  0x72   : > { %s745_s12 = smov %s545_s15  ;;  %20 = sbr.rel (!%p18_p3) target bundleno = 7 (0x7), region = 86 }
  0x77   :  { %233 = vsyncpa [#allocation3], 1 }
  0x78   :  { %235 = vsyncpa [#allocation3 + $0x1], 1 }
  0x79   :  { %236 = vsyncpa [#allocation6], 1 }
  0x7a   :  { %238 = vsyncpa [#allocation6 + $0x1], 1 }
  0x7b   :  { %239 = vsyncpa [#allocation4], 1 }
  0x7c   :  { %241 = vsyncpa [#allocation4 + $0x1], 1 }

</bundles_post_ra>
